<compile_context>
chip_gen: v5e
topology: v5e:2x2
jax: 0.10.0
libtpu: 0.0.40
codegen_flags: <defaults>
</compile_context>

<pallas_src>
import jax
import jax.numpy as jnp
from jax.experimental import pallas as pl
from jax.experimental.pallas import tpu as pltpu

IN_FEATURES = 28 * 28   # 784
OUT_FEATURES = 2


def basicnn_kernel(x_ref, w_ref, b_ref, o_ref):
    # x_ref: (1, 784) VMEM    w_ref: (2, 784) VMEM (torch layout, 1/255 folded)
    # b_ref: (2,)     SMEM    o_ref: (2, 1)   VMEM (column of probabilities)
    x = x_ref[...]                                                     # (1, 784)
    # Two logits: VPU broadcast-multiply + XLU lane reduction per class row.
    l0 = jnp.sum(w_ref[0:1, :] * x, axis=-1, keepdims=True) + b_ref[0]  # (1, 1)
    l1 = jnp.sum(w_ref[1:2, :] * x, axis=-1, keepdims=True) + b_ref[1]  # (1, 1)
    # Softmax over 2 classes == sigmoid of the logit difference.
    p0 = 1.0 / (1.0 + jnp.exp(l1 - l0))                                 # (1, 1)
    rows = jax.lax.broadcasted_iota(jnp.int32, (OUT_FEATURES, 1), 0)    # (2, 1)
    o_ref[...] = jnp.where(rows == 0, p0, 1.0 - p0)                     # (2, 1)


def prepare_params(weight, bias):
    """One-time parameter prep: fold the module's x/255 scaling into the
    weight (linearity => identical logits); keep torch (out, in) layout."""
    w_scaled = weight.astype(jnp.float32) * (1.0 / 255.0)   # (2, 784)
    b = bias.astype(jnp.float32)                            # (2,)
    return w_scaled, b


def basicnn_forward(x, w_scaled, bias):
    """x: any array with 784 elements (e.g. NCHW (1, 1, 28, 28)).
    w_scaled: (2, 784) pre-scaled torch-layout weight. bias: (2,)."""
    x2d = jnp.reshape(x.astype(jnp.float32), (1, IN_FEATURES))     # (1, 784)
    out_col = pl.pallas_call(
        basicnn_kernel,
        out_shape=jax.ShapeDtypeStruct((OUT_FEATURES, 1), jnp.float32),
        in_specs=[
            pl.BlockSpec(memory_space=pltpu.MemorySpace.VMEM),     # x
            pl.BlockSpec(memory_space=pltpu.MemorySpace.VMEM),     # weight
            pl.BlockSpec(memory_space=pltpu.MemorySpace.SMEM),     # bias
        ],
        out_specs=pl.BlockSpec(memory_space=pltpu.MemorySpace.VMEM),
    )(x2d, w_scaled, bias)
    # (2, 1) column -> (1, 2) row; same element order, trivial wrapper reshape.
    return out_col.reshape(1, OUT_FEATURES)


def reference_forward(x, weight, bias):
    x2d = jnp.reshape(x.astype(jnp.float32), (1, IN_FEATURES)) / 255.0
    logits = x2d @ weight.astype(jnp.float32).T + bias.astype(jnp.float32)
    return jax.nn.softmax(logits, axis=-1)


if __name__ == "__main__":
    key = jax.random.PRNGKey(0)
    kx, kw, kb = jax.random.split(key, 3)

    # Deterministic synthetic parameters (nn.Linear(784, 2) shapes).
    bound = 1.0 / (IN_FEATURES ** 0.5)      # torch default uniform init bound
    weight = jax.random.uniform(kw, (OUT_FEATURES, IN_FEATURES),
                                minval=-bound, maxval=bound, dtype=jnp.float32)
    bias = jax.random.uniform(kb, (OUT_FEATURES,),
                              minval=-bound, maxval=bound, dtype=jnp.float32)

    # Example input: NCHW image with raw-pixel-range values, as the module expects.
    x = jax.random.uniform(kx, (1, 1, 28, 28),
                           minval=0.0, maxval=255.0, dtype=jnp.float32)

    w_scaled, b = prepare_params(weight, bias)
    out = basicnn_forward(x, w_scaled, b)
    out = jax.block_until_ready(out)

    ref = reference_forward(x, weight, bias)
    assert out.shape == (1, OUT_FEATURES)
    assert jnp.allclose(out, ref, atol=1e-5, rtol=1e-5), (out, ref)
    assert jnp.allclose(jnp.sum(out, axis=-1), 1.0, atol=1e-5)

    print("KERNEL_OK")
</pallas_src>

<mosaic_0001>
module attributes {stable_mosaic.version = 11 : i64} {
  func.func @basicnn_kernel(%arg0: memref<1x784xf32, #tpu.memory_space<vmem>>, %arg1: memref<2x784xf32, #tpu.memory_space<vmem>>, %arg2: memref<2xf32, #tpu.memory_space<smem>>, %arg3: memref<2x1xf32, #tpu.memory_space<vmem>>) attributes {dimension_semantics = [], scalar_prefetch = 0 : i64, scratch_operands = 0 : i64, tpu.core_type = #tpu.core_type<tc>} {
    %c0 = arith.constant 0 : index
    %c0_0 = arith.constant 0 : index
    %0 = vector.load %arg0[%c0, %c0_0] : memref<1x784xf32, #tpu.memory_space<vmem>>, vector<1x784xf32>
    %c0_1 = arith.constant 0 : index
    %c0_2 = arith.constant 0 : index
    %1 = vector.load %arg1[%c0_1, %c0_2] : memref<2x784xf32, #tpu.memory_space<vmem>>, vector<1x784xf32>
    %2 = arith.mulf %1, %0 : vector<1x784xf32>
    %cst = arith.constant dense<0.000000e+00> : vector<1xf32>
    %3 = vector.multi_reduction <add>, %2, %cst [1] : vector<1x784xf32> to vector<1xf32>
    %4 = vector.shape_cast %3 : vector<1xf32> to vector<1x1xf32>
    %c0_3 = arith.constant 0 : index
    %5 = memref.load %arg2[%c0_3] : memref<2xf32, #tpu.memory_space<smem>>
    %6 = vector.broadcast %5 : f32 to vector<1x1xf32>
    %7 = arith.addf %4, %6 : vector<1x1xf32>
    %c1 = arith.constant 1 : index
    %c0_4 = arith.constant 0 : index
    %8 = vector.load %arg1[%c1, %c0_4] : memref<2x784xf32, #tpu.memory_space<vmem>>, vector<1x784xf32>
    %9 = arith.mulf %8, %0 : vector<1x784xf32>
    %cst_5 = arith.constant dense<0.000000e+00> : vector<1xf32>
    %10 = vector.multi_reduction <add>, %9, %cst_5 [1] : vector<1x784xf32> to vector<1xf32>
    %11 = vector.shape_cast %10 : vector<1xf32> to vector<1x1xf32>
    %c1_6 = arith.constant 1 : index
    %12 = memref.load %arg2[%c1_6] : memref<2xf32, #tpu.memory_space<smem>>
    %13 = vector.broadcast %12 : f32 to vector<1x1xf32>
    %14 = arith.addf %11, %13 : vector<1x1xf32>
    %15 = arith.subf %14, %7 : vector<1x1xf32>
    %16 = math.exp %15 : vector<1x1xf32>
    %cst_7 = arith.constant 1.000000e+00 : f32
    %17 = vector.broadcast %cst_7 : f32 to vector<1x1xf32>
    %18 = arith.addf %17, %16 : vector<1x1xf32>
    %cst_8 = arith.constant 1.000000e+00 : f32
    %19 = vector.broadcast %cst_8 : f32 to vector<1x1xf32>
    %20 = arith.divf %19, %18 : vector<1x1xf32>
    %21 = tpu.iota {dimensions = array<i32: 0>} : vector<2x1xi32>
    %c0_i32 = arith.constant 0 : i32
    %22 = vector.broadcast %c0_i32 : i32 to vector<2x1xi32>
    %23 = arith.cmpi eq, %21, %22 : vector<2x1xi32>
    %cst_9 = arith.constant 1.000000e+00 : f32
    %24 = vector.broadcast %cst_9 : f32 to vector<1x1xf32>
    %25 = arith.subf %24, %20 : vector<1x1xf32>
    %26 = vector.shape_cast %20 : vector<1x1xf32> to vector<1x1xf32>
    %27 = vector.broadcast %26 : vector<1x1xf32> to vector<2x1xf32>
    %28 = vector.shape_cast %25 : vector<1x1xf32> to vector<1x1xf32>
    %29 = vector.broadcast %28 : vector<1x1xf32> to vector<2x1xf32>
    %30 = arith.select %23, %27, %29 : vector<2x1xi1>, vector<2x1xf32>
    %c0_10 = arith.constant 0 : index
    %c0_11 = arith.constant 0 : index
    %31 = vector.load %arg3[%c0_10, %c0_11] : memref<2x1xf32, #tpu.memory_space<vmem>>, vector<2x1xf32>
    tpu.vector_store %arg3[%c0_10, %c0_11], %30 {strides = array<i32>} : memref<2x1xf32, #tpu.memory_space<vmem>>, vector<2x1xf32>,
    return
  }
}

</mosaic_0001>

<bundles_post_ra>
// kernel: tpu_custom_call.1
= control target key start
LH: loop header
LB: loop body
LE: loop exit
PB: predicated region body
PF: predicated region fallthrough
CT: control target
= control target key end

     0   :  { %8 = vsyncpa [#allocation3], 0  ;;  %s287_s0 = inlined_call_operand.hbm [shape: f32[1,784], index: 0, kind: input, shape index: {}]   ;;  %s288_s1 = inlined_call_operand.hbm [shape: f32[2,784], index: 1, kind: input, shape index: {}]   ;;  %s289_s2 = inlined_call_operand.vmem [shape: f32[2], index: 2, kind: input, shape index: {}]   ;;  %s290_s3 = inlined_call_operand.vmem [shape: f32[2,1], index: 3, kind: output, shape index: {}]  }
   0x1   :  { %9 = vsyncpa [#allocation6], 0  ;;  %s16_s14 = sshll.u32 %s287_s0, 4  ;;  %s17_s14 = int_to_ptr.hbm [resolvable:$true] %s16_s14 }
   0x2   :  { %10 = vsyncpa [#allocation4], 0  ;;  %s238_s15 = smov [#allocation2]   ;;  %s27_s19 = sshll.u32 %s288_s1, 4  ;;  %s28_s19 = int_to_ptr.hbm [resolvable:$true] %s27_s19 }
   0x3   :  { %s18_s16 = sshll.u32 %s238_s15, 4  ;;  %s239_s20 = smov [#allocation5]   ;;  %s19_s16 = int_to_ptr.vmem [resolvable:$true] %s18_s16 }
   0x4   :  { %21 = dma.hbm_to_vmem [thread:$0]  %s17_s14, 112, %s19_s16, [#allocation3]  }
   0x5   :  { %s29_s21 = sshll.u32 %s239_s20, 4  ;;  %s38_s24 = sshll.u32 %s289_s2, 4  ;;  %s30_s21 = int_to_ptr.vmem [resolvable:$true] %s29_s21  ;;  %s39_s24 = int_to_ptr.vmem [resolvable:$true] %s38_s24 }
   0x6   :  { %32 = dma.hbm_to_vmem [thread:$0]  %s28_s19, 224, %s30_s21, [#allocation6]  }
   0x7   :  { %s240_s0 = smov [#allocation7]  }
   0x8   :  { %41 = dma.vmem_to_smem %s39_s24, 16, %s240_s0, [#allocation4]  }
   0x9   :  { %232 = dma.done.wait [#allocation3], 112  }
   0xa   :  { %233 = vsyncadd [#allocation3], 4294967184 }
   0xb   :  { %234 = dma.done.wait [#allocation6], 224  }
   0xc   :  { %235 = vsyncadd [#allocation6], 4294967072 }
   0xd   :  { %236 = dma.done.wait [#allocation4], 16  }
   0xe   :  { %237 = vsyncadd [#allocation4], 4294967280 }
   0xf   :  { %54 = sfence }
  0x10   :  { %v55_v0 = vld [vmem:[#allocation2] sm:$0x7f]  ;;  %v56_v1 = vld [vmem:[#allocation5] ss:$2 sm:$0x7f]  ;;  %vm73_vm0 = vcmask 1040384   ;;  %v148_v58 = vlaneseq }
  0x11   :  { %v57_v2 = vmul.f32 %v56_v1, %v55_v0  ;;  %v94_v3 = vld [vmem:[#allocation5 + $0x1] ss:$2 sm:$0x7f]  ;;  %vm85_vm1 = vcmask 122880   ;;  %s90_s1 = sld [smem:[#allocation7]]  ;;  %vm155_vm7 = vcmask 1024  }
  0x12   :  { %v95_v4 = vmul.f32 %v94_v3, %v55_v0  ;;  %s164_s2 = sld [smem:[#allocation7 + $0x1]]  ;;  %v149_v63 = vshrl.u32 %v148_v58, 7 }
  0x13   :  { %v59_v5 = vperm.slane %v57_v2, 0  ;;  %v60_v6 = vperm.slane %v57_v2, 1  ;;  %v61_v7 = vperm.slane %v57_v2, 2  ;;  %v62_v8 = vperm.slane %v57_v2, 3 }
  0x14   :  { %v97_v9 = vperm.slane %v95_v4, 0  ;;  %v63_v10 = vperm.slane %v57_v2, 4  ;;  %v64_v14 = vperm.slane %v57_v2, 5  ;;  %v98_v17 = vperm.slane %v95_v4, 1 }
  0x15   :  { %v74_v11 = vsel %vm73_vm0, %v59_v5, 0.0  ;;  %v75_v12 = vsel %vm73_vm0, %v60_v6, 0.0  ;;  %v77_v13 = vsel %vm73_vm0, %v61_v7, 0.0  ;;  %v79_v16 = vsel %vm73_vm0, %v62_v8, 0.0 }
  0x16   :  { %v76_v15 = vadd.f32 %v75_v12, %v74_v11  ;;  %v99_v18 = vperm.slane %v95_v4, 2  ;;  %v100_v19 = vperm.slane %v95_v4, 3  ;;  %v65_v20 = vperm.slane %v57_v2, 6 }
  0x17   :  { %v111_v22 = vsel %vm73_vm0, %v97_v9, 0.0  ;;  %v81_v23 = vsel %vm73_vm0, %v63_v10, 0.0  ;;  %v101_v24 = vperm.slane %v95_v4, 4  ;;  %v112_v25 = vsel %vm73_vm0, %v98_v17, 0.0 }
  0x18   :  { %v78_v21 = vadd.f32 %v77_v13, %v76_v15  ;;  %v114_v26 = vsel %vm73_vm0, %v99_v18, 0.0  ;;  %v113_v28 = vadd.f32 %v112_v25, %v111_v22  ;;  %v83_v29 = vsel %vm73_vm0, %v64_v14, 0.0 }
  0x19   :  { %v102_v30 = vperm.slane %v95_v4, 5  ;;  %v116_v31 = vsel %vm73_vm0, %v100_v19, 0.0  ;;  %v86_v34 = vsel %vm85_vm1, %v65_v20, 0.0  ;;  %v118_v35 = vsel %vm73_vm0, %v101_v24, 0.0 }
  0x1a   :  { %v80_v27 = vadd.f32 %v79_v16, %v78_v21  ;;  %v115_v33 = vadd.f32 %v114_v26, %v113_v28  ;;  %v103_v38 = vperm.slane %v95_v4, 6  ;;  %v91_v46 = vstv %s90_s1 }
  0x1b   :  { %v120_v39 = vsel %vm73_vm0, %v102_v30, 0.0  ;;  %v127_v47 = vstv %s164_s2  ;;  %vm150_vm6 = vcmp.eq.s32.totalorder %v149_v63, 0 }
  0x1c   :  { %v82_v32 = vadd.f32 %v81_v23, %v80_v27  ;;  %v117_v37 = vadd.f32 %v116_v31, %v115_v33  ;;  %v122_v43 = vsel %vm85_vm1, %v103_v38, 0.0 }
  0x1e   :  { %v84_v36 = vadd.f32 %v83_v29, %v82_v32  ;;  %v119_v41 = vadd.f32 %v118_v35, %v117_v37 }
  0x20   :  { %v87_v40 = vadd.f32 %v86_v34, %v84_v36  ;;  %v121_v42 = vadd.f32 %v120_v39, %v119_v41 }
  0x22   :  { %88 = vadd.xlane.f32.xlu0 %v87_v40  ;;  %v123_v44 = vadd.f32 %v122_v43, %v121_v42 }
  0x2a   :  { %124 = vadd.xlane.f32.xlu0 %v123_v44 }
  0x95   :  { %v89_v45 = vpop.xlane.xlu0 %88 }
  0x96   :  { %v92_v49 = vadd.f32 %v91_v46, %v89_v45 }
  0x9d   :  { %v125_v48 = vpop.xlane.xlu0 %124 }
  0x9e   :  { %v128_v50 = vadd.f32 %v127_v47, %v125_v48 }
  0xa0   :  { %v129_v51 = vsub.f32 %v128_v50, %v92_v49 }
  0xa2   :  { %v130_v52 = vmul.f32 1.442695, %v129_v51 }
  0xa4   :  { %168 = vpow2.f32 %v130_v52 }
  0xaa   :  { %v169_v53 = vpop.eup %168 }
  0xab   :  { %v132_v54 = vadd.f32 1.0, %v169_v53 }
  0xad   :  { %170 = vrcp.f32 %v132_v54  ;;  %v144_v59 = vand.u32 2147483648, %v132_v54  ;;  %v142_v61 = vand.u32 2147483647, %v132_v54  ;;  %vm138_vm3 = vweird.f32 %v132_v54 }
  0xaf   :  { %v145_v0 = vor.u32 1.1754944e-38, %v144_v59  ;;  %vm143_vm5 = vcmp.eq.f32.partialorder %v142_v61, 8.507059e+37 }
  0xb3   :  { %v171_v55 = vpop.eup %170 }
  0xb4   :  { %v134_v56 = vmul.f32 %v171_v55, %v132_v54  ;;  %vm139_vm2 = vweird.f32 %v171_v55 }
  0xb5   :  { %vm140_vm4 = vmor %vm138_vm3, %vm139_vm2 }
  0xb6   :  { %v135_v57 = vsub.f32 1.0, %v134_v56 }
  0xb8   :  { %v136_v60 = vmul.f32 %v171_v55, %v135_v57 }
  0xba   :  { %v137_v62 = vadd.f32 %v171_v55, %v136_v60 }
  0xbc   :  { %v141_v1 = vsel %vm140_vm4, %v171_v55, %v137_v62 }
  0xbd   :  { %v146_v2 = vsel %vm143_vm5, %v145_v0, %v141_v1 }
  0xbe   :  { %v151_v3 = vsub.f32 1.0, %v146_v2  ;;  %v152_v4 = vperm.slane %v146_v2, 0 }
  0xc0   :  { %v153_v5 = vperm.slane %v151_v3, 0 }
  0xc2   :  { %v154_v6 = vsel %vm150_vm6, %v152_v4, %v153_v5 }
  0xc3   :  { %156 = vst.msk [vmem:[%s290_s3] sm:$0x3] %vm155_vm7, %v154_v6 }
  0xc4   :  { %161 = vsyncpa [#allocation3], 1 }
  0xc5   :  { %162 = vsyncpa [#allocation6], 1 }
  0xc6   :  { %163 = vsyncpa [#allocation4], 1 }

</bundles_post_ra>
